<compile_context>
chip_gen: v7x
topology: tpu7x:2x2x1
jax: 0.10.0
libtpu: 0.0.40
codegen_flags: <defaults>
</compile_context>

<pallas_src>
import functools
import math

import jax
import jax.numpy as jnp
from jax.experimental import pallas as pl
from jax.experimental.pallas import tpu as pltpu

FEATURES = 15
FEATURES_PADDED = 16       # lane-dense packing needs a power-of-two row width
HIDDEN_DIM = 128           # small-shape variant of the default 512 hidden dim
NUM_CLASSES = 16
PACK = 8                   # batch rows packed per 128-lane row (128 // 16)

# Packed layout: per-buffer x / out blocks are tile_b*64 B (0.5 MiB @ 8192);
# dominant VMEM users are the (tile_b, 128) h intermediate and the lane-padded
# (tile_b, 16) views (~4 MiB each) -> ~16-20 MiB total, under the 32 MiB limit
# and within v7x's 64 MiB/TC.  Un-packed fallback keeps the previous 4096 tile.
TILE_B_PACKED = 8192
TILE_B_UNPACKED = 4096

_INV_SQRT2 = 1.0 / math.sqrt(2.0)

FEATURE_MIN = jnp.array(
    [-10.5433282251965, -5.18366373737265, 33.9, 32.4, 1.214, -0.002,
     -59.29009, -0.524374801782275, -77.1714212303812, -24.869, -153.362,
     -19.7706017189303, -90.0, 0.1, 23.3], dtype=jnp.float32)
FEATURE_MAX = jnp.array(
    [12.9529095060724, 14.8862417199696, 105.0, 96.9, 6539.259, 360.001,
     40.978, 54.057, 22.3052008380727, 25.15, -62.7413771784932, 27.815,
     269.4, 224889.3, 36.4], dtype=jnp.float32)


def _pid_kernel(x_ref, w1_ref, b1_ref, w2_ref, b2_ref, o_ref, *, packed):
    # Normalization is pre-folded into W1'/b1' (wrapper), so the kernel only
    # needs the torch-.long()-style truncation before the first matmul.
    x = jnp.trunc(x_ref[...])          # trunc on the lane-dense block when packed
    if packed:
        # (tile_b//8, 8*16) packed rows -> (tile_b, 16) for the MXU.
        x = x.reshape(x.shape[0] * PACK, x.shape[1] // PACK)

    # fc1 (+ dropout = identity in eval) + exact-erf GELU: the GELU is the
    # VALU-bound critical path; MXU / HBM have slack.
    h = jnp.dot(x, w1_ref[...], preferred_element_type=jnp.float32) + b1_ref[...]
    h = 0.5 * h * (1.0 + jax.lax.erf(h * _INV_SQRT2))

    # fc2
    logits = jnp.dot(h, w2_ref[...], preferred_element_type=jnp.float32) + b2_ref[...]
    if packed:
        # (tile_b, 16) -> (tile_b//8, 128): lane-dense, unmasked stores.
        logits = logits.reshape(logits.shape[0] // PACK, logits.shape[1] * PACK)
    o_ref[...] = logits.astype(o_ref.dtype)


def _round_up(n, m):
    return ((n + m - 1) // m) * m


def _forward(x, w1f, b1f, w2, b2, *, tile_b, packed):
    """x: (B, F). w1f already normalization-folded (and feature-padded if packed)."""
    B = x.shape[0]
    if tile_b is None:
        tile_b = TILE_B_PACKED if packed else TILE_B_UNPACKED
    # Tile must be a multiple of 64 so the packed block's sublane dim stays a
    # multiple of 8; never larger than the (rounded-up) batch.
    tile_b = _round_up(max(64, min(tile_b, _round_up(B, 64))), 64)
    padded_b = _round_up(B, tile_b)
    num_tiles = padded_b // tile_b

    f_in = w1f.shape[0]
    if packed:
        # Pad batch rows (zeros -> well-defined junk rows, sliced off below) and
        # features 15 -> 16, then view 8 consecutive rows as one 128-lane row.
        # The reshape is free: identical row-major byte layout.
        x = jnp.pad(x, ((0, padded_b - B), (0, f_in - x.shape[1])))
        x = x.reshape(padded_b // PACK, PACK * f_in)
        x_spec = pl.BlockSpec((tile_b // PACK, PACK * f_in), lambda i: (i, 0))
        out_spec = pl.BlockSpec((tile_b // PACK, PACK * NUM_CLASSES), lambda i: (i, 0))
        out_shape = jax.ShapeDtypeStruct((padded_b // PACK, PACK * NUM_CLASSES), jnp.float32)
    else:
        if padded_b != B:
            x = jnp.pad(x, ((0, padded_b - B), (0, 0)))
        x_spec = pl.BlockSpec((tile_b, f_in), lambda i: (i, 0))
        out_spec = pl.BlockSpec((tile_b, NUM_CLASSES), lambda i: (i, 0))
        out_shape = jax.ShapeDtypeStruct((padded_b, NUM_CLASSES), jnp.float32)

    # Weights/biases use constant index maps -> stay VMEM-resident across steps.
    const = lambda shape: pl.BlockSpec(shape, lambda i: (0, 0))

    out = pl.pallas_call(
        functools.partial(_pid_kernel, packed=packed),
        out_shape=out_shape,
        grid=(num_tiles,),
        in_specs=[
            x_spec,                 # x (tiled over batch, lane-dense if packed)
            const(w1f.shape),       # W1' (normalization folded, pre-transposed)
            const(b1f.shape),       # b1'
            const(w2.shape),        # W2 (pre-transposed)
            const(b2.shape),        # b2
        ],
        out_specs=out_spec,
        compiler_params=pltpu.CompilerParams(
            # TODO(synk): on v7x consider pltpu.CORE_PARALLEL (or an explicit
            # leading grid axis of size 2) to guarantee both TensorCores run.
            dimension_semantics=("parallel",),
            vmem_limit_bytes=32 * 1024 * 1024,
        ),
    )(x, w1f, b1f, w2, b2)

    if packed:
        out = out.reshape(padded_b, NUM_CLASSES)   # free: same row-major layout
    return out[:B] if padded_b != B else out


_PACKED_OK = None


def _lane_dense_packing_supported():
    """One-time probe: compile + run the packed-layout kernel at a tiny shape and
    check it against plain JAX.  Falls back to the un-packed layout if the
    in-kernel (rows,128) <-> (8*rows,16) reshapes do not lower here."""
    global _PACKED_OK
    if _PACKED_OK is None:
        try:
            b = 64
            kx, kw1, kw2 = jax.random.split(jax.random.PRNGKey(123), 3)
            x = jax.random.uniform(kx, (b, FEATURES), jnp.float32, -3.0, 3.0)
            w1f = 0.1 * jax.random.normal(kw1, (FEATURES_PADDED, HIDDEN_DIM), jnp.float32)
            b1f = jnp.zeros((1, HIDDEN_DIM), jnp.float32)
            w2 = 0.1 * jax.random.normal(kw2, (HIDDEN_DIM, NUM_CLASSES), jnp.float32)
            b2 = jnp.zeros((1, NUM_CLASSES), jnp.float32)
            got = _forward(x, w1f, b1f, w2, b2, tile_b=b, packed=True)
            jax.block_until_ready(got)
            xp = jnp.pad(jnp.trunc(x), ((0, 0), (0, FEATURES_PADDED - FEATURES)))
            hp = xp @ w1f + b1f
            hp = 0.5 * hp * (1.0 + jax.lax.erf(hp * _INV_SQRT2))
            want = hp @ w2 + b2
            _PACKED_OK = bool(jnp.allclose(got, want, atol=1e-4, rtol=1e-4))
        except Exception:
            _PACKED_OK = False
    return _PACKED_OK


def pitch_identifier_linear(x, params, *, tile_b=None):
    """x: (B, FEATURES) float32. Returns logits (B, NUM_CLASSES) float32."""
    fmin, fmax, w1, b1, w2, b2 = params

    # Fold the affine normalization into fc1 (tiny one-off host-side math):
    #   (trunc(x) - fmin) * inv @ w1 + b1 == trunc(x) @ (inv[:,None]*w1) + (b1 - (fmin*inv)@w1)
    inv_range = 1.0 / (fmax - fmin)                       # (1, F)
    w1f = w1 * inv_range.reshape(FEATURES, 1)             # (F, H)
    b1f = b1 - (fmin * inv_range) @ w1                    # (1, H)

    packed = _lane_dense_packing_supported()
    if packed:
        # Zero row for the padded 16th feature column (padded x is zero anyway).
        w1f = jnp.pad(w1f, ((0, FEATURES_PADDED - FEATURES), (0, 0)))

    return _forward(x, w1f, b1f, w2, b2, tile_b=tile_b, packed=packed)


def init_params(key):
    """Deterministic init matching nn.Linear default U(-1/sqrt(fan_in), 1/sqrt(fan_in))."""
    k1, k2, k3, k4 = jax.random.split(key, 4)
    bound1 = 1.0 / math.sqrt(FEATURES)
    bound2 = 1.0 / math.sqrt(HIDDEN_DIM)
    # stored transposed: (in, out)
    w1 = jax.random.uniform(k1, (FEATURES, HIDDEN_DIM), jnp.float32, -bound1, bound1)
    b1 = jax.random.uniform(k2, (1, HIDDEN_DIM), jnp.float32, -bound1, bound1)
    w2 = jax.random.uniform(k3, (HIDDEN_DIM, NUM_CLASSES), jnp.float32, -bound2, bound2)
    b2 = jax.random.uniform(k4, (1, NUM_CLASSES), jnp.float32, -bound2, bound2)
    fmin = FEATURE_MIN.reshape(1, FEATURES)
    fmax = FEATURE_MAX.reshape(1, FEATURES)
    return fmin, fmax, w1, b1, w2, b2


def _reference(x, params):
    """Un-folded reference (matches the PyTorch module math, eval mode)."""
    fmin, fmax, w1, b1, w2, b2 = params
    xn = (jnp.trunc(x) - fmin) / (fmax - fmin)
    h = xn @ w1 + b1
    h = 0.5 * h * (1.0 + jax.lax.erf(h / jnp.sqrt(2.0)))
    return h @ w2 + b2


if __name__ == "__main__":
    key = jax.random.PRNGKey(0)
    pkey, xkey1, xkey2 = jax.random.split(key, 3)
    params = init_params(pkey)

    # Case 1: small aligned batch.
    B = 8
    u = jax.random.uniform(xkey1, (B, FEATURES), jnp.float32)
    x = FEATURE_MIN[None, :] + u * (FEATURE_MAX - FEATURE_MIN)[None, :]

    logits = pitch_identifier_linear(x, params)
    jax.block_until_ready(logits)
    assert logits.shape == (B, NUM_CLASSES)
    assert logits.dtype == jnp.float32
    assert jnp.allclose(logits, _reference(x, params), atol=2e-5, rtol=1e-5)

    # Case 2: ragged batch (exercises pad / pack / slice path around the grid).
    B2 = 100
    u2 = jax.random.uniform(xkey2, (B2, FEATURES), jnp.float32)
    x2 = FEATURE_MIN[None, :] + u2 * (FEATURE_MAX - FEATURE_MIN)[None, :]

    logits2 = pitch_identifier_linear(x2, params)
    jax.block_until_ready(logits2)
    assert logits2.shape == (B2, NUM_CLASSES)
    assert logits2.dtype == jnp.float32
    assert jnp.allclose(logits2, _reference(x2, params), atol=2e-5, rtol=1e-5)

    # TODO(synk): dropout is implemented as identity (eval mode); training-mode
    # stochastic masking would need pltpu.prng_* inside the kernel.
    print("KERNEL_OK")
</pallas_src>

<mosaic_0001>
module attributes {stable_mosaic.version = 11 : i64} {
  func.func @_pid_kernel(%arg0: i32, %arg1: memref<8x128xf32, #tpu.memory_space<vmem>>, %arg2: memref<16x128xf32, #tpu.memory_space<vmem>>, %arg3: memref<1x128xf32, #tpu.memory_space<vmem>>, %arg4: memref<128x16xf32, #tpu.memory_space<vmem>>, %arg5: memref<1x16xf32, #tpu.memory_space<vmem>>, %arg6: memref<8x128xf32, #tpu.memory_space<vmem>>) attributes {dimension_semantics = [#tpu.dimension_semantics<parallel>], iteration_bounds = array<i64: 1>, scalar_prefetch = 0 : i64, scratch_operands = 0 : i64, tpu.core_type = #tpu.core_type<tc>, window_params = [{transform_indices = @transform_0, window_bounds = array<i64: 8, 128>}, {pipeline_mode = #tpu.pipeline_mode<synchronous>, transform_indices = @transform_1, window_bounds = array<i64: 16, 128>}, {pipeline_mode = #tpu.pipeline_mode<synchronous>, transform_indices = @transform_2, window_bounds = array<i64: 1, 128>}, {pipeline_mode = #tpu.pipeline_mode<synchronous>, transform_indices = @transform_3, window_bounds = array<i64: 128, 16>}, {pipeline_mode = #tpu.pipeline_mode<synchronous>, transform_indices = @transform_4, window_bounds = array<i64: 1, 16>}, {transform_indices = @transform_5, window_bounds = array<i64: 8, 128>}]} {
    %c0 = arith.constant 0 : index
    %c0_0 = arith.constant 0 : index
    %0 = vector.load %arg1[%c0, %c0_0] : memref<8x128xf32, #tpu.memory_space<vmem>>, vector<8x128xf32>
    %cst = arith.constant 0.000000e+00 : f32
    %1 = vector.broadcast %cst : f32 to vector<8x128xf32>
    %2 = arith.cmpf olt, %0, %1 : vector<8x128xf32>
    %3 = math.ceil %0 : vector<8x128xf32>
    %4 = math.floor %0 : vector<8x128xf32>
    %5 = arith.select %2, %3, %4 : vector<8x128xi1>, vector<8x128xf32>
    %6 = vector.shape_cast %5 : vector<8x128xf32> to vector<64x16xf32>
    %c0_1 = arith.constant 0 : index
    %c0_2 = arith.constant 0 : index
    %7 = vector.load %arg2[%c0_1, %c0_2] : memref<16x128xf32, #tpu.memory_space<vmem>>, vector<16x128xf32>
    %cst_3 = arith.constant dense<0.000000e+00> : vector<64x128xf32>
    %8 = tpu.matmul %6, %7, %cst_3 {dimension_numbers = #tpu.dot_dimension_numbers<[1], [0], [0], [1], [0, 0, 1, 1], [], []>} : vector<64x16xf32>, vector<16x128xf32>, vector<64x128xf32> -> vector<64x128xf32>
    %c0_4 = arith.constant 0 : index
    %c0_5 = arith.constant 0 : index
    %9 = vector.load %arg3[%c0_4, %c0_5] : memref<1x128xf32, #tpu.memory_space<vmem>>, vector<1x128xf32>
    %10 = vector.broadcast %9 : vector<1x128xf32> to vector<64x128xf32>
    %11 = arith.addf %8, %10 : vector<64x128xf32>
    %cst_6 = arith.constant 5.000000e-01 : f32
    %12 = vector.broadcast %cst_6 : f32 to vector<64x128xf32>
    %13 = arith.mulf %12, %11 : vector<64x128xf32>
    %cst_7 = arith.constant 0.707106769 : f32
    %14 = vector.broadcast %cst_7 : f32 to vector<64x128xf32>
    %15 = arith.mulf %11, %14 : vector<64x128xf32>
    %16 = math.erf %15 : vector<64x128xf32>
    %cst_8 = arith.constant 1.000000e+00 : f32
    %17 = vector.broadcast %cst_8 : f32 to vector<64x128xf32>
    %18 = arith.addf %17, %16 : vector<64x128xf32>
    %19 = arith.mulf %13, %18 : vector<64x128xf32>
    %c0_9 = arith.constant 0 : index
    %c0_10 = arith.constant 0 : index
    %20 = vector.load %arg4[%c0_9, %c0_10] : memref<128x16xf32, #tpu.memory_space<vmem>>, vector<128x16xf32>
    %cst_11 = arith.constant dense<0.000000e+00> : vector<64x16xf32>
    %21 = tpu.matmul %19, %20, %cst_11 {dimension_numbers = #tpu.dot_dimension_numbers<[1], [0], [0], [1], [0, 0, 1, 1], [], []>} : vector<64x128xf32>, vector<128x16xf32>, vector<64x16xf32> -> vector<64x16xf32>
    %c0_12 = arith.constant 0 : index
    %c0_13 = arith.constant 0 : index
    %22 = vector.load %arg5[%c0_12, %c0_13] : memref<1x16xf32, #tpu.memory_space<vmem>>, vector<1x16xf32>
    %23 = vector.broadcast %22 : vector<1x16xf32> to vector<64x16xf32>
    %24 = arith.addf %21, %23 : vector<64x16xf32>
    %25 = vector.shape_cast %24 : vector<64x16xf32> to vector<8x128xf32>
    %c0_14 = arith.constant 0 : index
    %c0_15 = arith.constant 0 : index
    %26 = vector.load %arg6[%c0_14, %c0_15] : memref<8x128xf32, #tpu.memory_space<vmem>>, vector<8x128xf32>
    tpu.vector_store %arg6[%c0_14, %c0_15], %25 {strides = array<i32>} : memref<8x128xf32, #tpu.memory_space<vmem>>, vector<8x128xf32>,
    return
  }
  func.func @transform_0(%arg0: i32) -> (i32, i32) {
    %c0_i32 = arith.constant 0 : i32
    %c0_i32_0 = arith.constant 0 : i32
    return %arg0, %c0_i32 : i32, i32
  }
  func.func @transform_1(%arg0: i32) -> (i32, i32) {
    %c0_i32 = arith.constant 0 : i32
    %c0_i32_0 = arith.constant 0 : i32
    %c0_i32_1 = arith.constant 0 : i32
    return %c0_i32, %c0_i32_0 : i32, i32
  }
  func.func @transform_2(%arg0: i32) -> (i32, i32) {
    %c0_i32 = arith.constant 0 : i32
    %c0_i32_0 = arith.constant 0 : i32
    %c0_i32_1 = arith.constant 0 : i32
    return %c0_i32, %c0_i32_0 : i32, i32
  }
  func.func @transform_3(%arg0: i32) -> (i32, i32) {
    %c0_i32 = arith.constant 0 : i32
    %c0_i32_0 = arith.constant 0 : i32
    %c0_i32_1 = arith.constant 0 : i32
    return %c0_i32, %c0_i32_0 : i32, i32
  }
  func.func @transform_4(%arg0: i32) -> (i32, i32) {
    %c0_i32 = arith.constant 0 : i32
    %c0_i32_0 = arith.constant 0 : i32
    %c0_i32_1 = arith.constant 0 : i32
    return %c0_i32, %c0_i32_0 : i32, i32
  }
  func.func @transform_5(%arg0: i32) -> (i32, i32) {
    %c0_i32 = arith.constant 0 : i32
    %c0_i32_0 = arith.constant 0 : i32
    return %arg0, %c0_i32 : i32, i32
  }
}

module attributes {stable_mosaic.version = 11 : i64} {
  func.func @_pid_kernel(%arg0: i32, %arg1: memref<64x15xf32, #tpu.memory_space<vmem>>, %arg2: memref<15x128xf32, #tpu.memory_space<vmem>>, %arg3: memref<1x128xf32, #tpu.memory_space<vmem>>, %arg4: memref<128x16xf32, #tpu.memory_space<vmem>>, %arg5: memref<1x16xf32, #tpu.memory_space<vmem>>, %arg6: memref<64x16xf32, #tpu.memory_space<vmem>>) attributes {dimension_semantics = [#tpu.dimension_semantics<parallel>], iteration_bounds = array<i64: 1>, scalar_prefetch = 0 : i64, scratch_operands = 0 : i64, tpu.core_type = #tpu.core_type<tc>, window_params = [{transform_indices = @transform_0, window_bounds = array<i64: 64, 15>}, {pipeline_mode = #tpu.pipeline_mode<synchronous>, transform_indices = @transform_1, window_bounds = array<i64: 15, 128>}, {pipeline_mode = #tpu.pipeline_mode<synchronous>, transform_indices = @transform_2, window_bounds = array<i64: 1, 128>}, {pipeline_mode = #tpu.pipeline_mode<synchronous>, transform_indices = @transform_3, window_bounds = array<i64: 128, 16>}, {pipeline_mode = #tpu.pipeline_mode<synchronous>, transform_indices = @transform_4, window_bounds = array<i64: 1, 16>}, {transform_indices = @transform_5, window_bounds = array<i64: 64, 16>}]} {
    %c0 = arith.constant 0 : index
    %c0_0 = arith.constant 0 : index
    %0 = vector.load %arg1[%c0, %c0_0] : memref<64x15xf32, #tpu.memory_space<vmem>>, vector<64x15xf32>
    %cst = arith.constant 0.000000e+00 : f32
    %1 = vector.broadcast %cst : f32 to vector<64x15xf32>
    %2 = arith.cmpf olt, %0, %1 : vector<64x15xf32>
    %3 = math.ceil %0 : vector<64x15xf32>
    %4 = math.floor %0 : vector<64x15xf32>
    %5 = arith.select %2, %3, %4 : vector<64x15xi1>, vector<64x15xf32>
    %c0_1 = arith.constant 0 : index
    %c0_2 = arith.constant 0 : index
    %6 = vector.load %arg2[%c0_1, %c0_2] : memref<15x128xf32, #tpu.memory_space<vmem>>, vector<15x128xf32>
    %cst_3 = arith.constant dense<0.000000e+00> : vector<64x128xf32>
    %7 = tpu.matmul %5, %6, %cst_3 {dimension_numbers = #tpu.dot_dimension_numbers<[1], [0], [0], [1], [0, 0, 1, 1], [], []>} : vector<64x15xf32>, vector<15x128xf32>, vector<64x128xf32> -> vector<64x128xf32>
    %c0_4 = arith.constant 0 : index
    %c0_5 = arith.constant 0 : index
    %8 = vector.load %arg3[%c0_4, %c0_5] : memref<1x128xf32, #tpu.memory_space<vmem>>, vector<1x128xf32>
    %9 = vector.broadcast %8 : vector<1x128xf32> to vector<64x128xf32>
    %10 = arith.addf %7, %9 : vector<64x128xf32>
    %cst_6 = arith.constant 5.000000e-01 : f32
    %11 = vector.broadcast %cst_6 : f32 to vector<64x128xf32>
    %12 = arith.mulf %11, %10 : vector<64x128xf32>
    %cst_7 = arith.constant 0.707106769 : f32
    %13 = vector.broadcast %cst_7 : f32 to vector<64x128xf32>
    %14 = arith.mulf %10, %13 : vector<64x128xf32>
    %15 = math.erf %14 : vector<64x128xf32>
    %cst_8 = arith.constant 1.000000e+00 : f32
    %16 = vector.broadcast %cst_8 : f32 to vector<64x128xf32>
    %17 = arith.addf %16, %15 : vector<64x128xf32>
    %18 = arith.mulf %12, %17 : vector<64x128xf32>
    %c0_9 = arith.constant 0 : index
    %c0_10 = arith.constant 0 : index
    %19 = vector.load %arg4[%c0_9, %c0_10] : memref<128x16xf32, #tpu.memory_space<vmem>>, vector<128x16xf32>
    %cst_11 = arith.constant dense<0.000000e+00> : vector<64x16xf32>
    %20 = tpu.matmul %18, %19, %cst_11 {dimension_numbers = #tpu.dot_dimension_numbers<[1], [0], [0], [1], [0, 0, 1, 1], [], []>} : vector<64x128xf32>, vector<128x16xf32>, vector<64x16xf32> -> vector<64x16xf32>
    %c0_12 = arith.constant 0 : index
    %c0_13 = arith.constant 0 : index
    %21 = vector.load %arg5[%c0_12, %c0_13] : memref<1x16xf32, #tpu.memory_space<vmem>>, vector<1x16xf32>
    %22 = vector.broadcast %21 : vector<1x16xf32> to vector<64x16xf32>
    %23 = arith.addf %20, %22 : vector<64x16xf32>
    %c0_14 = arith.constant 0 : index
    %c0_15 = arith.constant 0 : index
    %24 = vector.load %arg6[%c0_14, %c0_15] : memref<64x16xf32, #tpu.memory_space<vmem>>, vector<64x16xf32>
    tpu.vector_store %arg6[%c0_14, %c0_15], %23 {strides = array<i32>} : memref<64x16xf32, #tpu.memory_space<vmem>>, vector<64x16xf32>,
    return
  }
  func.func @transform_0(%arg0: i32) -> (i32, i32) {
    %c0_i32 = arith.constant 0 : i32
    %c0_i32_0 = arith.constant 0 : i32
    return %arg0, %c0_i32 : i32, i32
  }
  func.func @transform_1(%arg0: i32) -> (i32, i32) {
    %c0_i32 = arith.constant 0 : i32
    %c0_i32_0 = arith.constant 0 : i32
    %c0_i32_1 = arith.constant 0 : i32
    return %c0_i32, %c0_i32_0 : i32, i32
  }
  func.func @transform_2(%arg0: i32) -> (i32, i32) {
    %c0_i32 = arith.constant 0 : i32
    %c0_i32_0 = arith.constant 0 : i32
    %c0_i32_1 = arith.constant 0 : i32
    return %c0_i32, %c0_i32_0 : i32, i32
  }
  func.func @transform_3(%arg0: i32) -> (i32, i32) {
    %c0_i32 = arith.constant 0 : i32
    %c0_i32_0 = arith.constant 0 : i32
    %c0_i32_1 = arith.constant 0 : i32
    return %c0_i32, %c0_i32_0 : i32, i32
  }
  func.func @transform_4(%arg0: i32) -> (i32, i32) {
    %c0_i32 = arith.constant 0 : i32
    %c0_i32_0 = arith.constant 0 : i32
    %c0_i32_1 = arith.constant 0 : i32
    return %c0_i32, %c0_i32_0 : i32, i32
  }
  func.func @transform_5(%arg0: i32) -> (i32, i32) {
    %c0_i32 = arith.constant 0 : i32
    %c0_i32_0 = arith.constant 0 : i32
    return %arg0, %c0_i32 : i32, i32
  }
}

</mosaic_0001>

<bundles_post_ra>
// kernel: tpu_custom_call.1
= control target key start
LH: loop header
LB: loop body
LE: loop exit
PB: predicated region body
PF: predicated region fallthrough
CT: control target
= control target key end

     0   :  { %vm94_vm0 = vcmask 1046528   ;;  %vm560_vm1 = vmmov 1   ;;  %vm69_vm3 = vcmask 121856   ;;  %vm371_vm12 = vcmask 130048   ;;  %s724_s1 = inlined_call_operand.vmem [shape: f32[15,128], index: 1, kind: input, shape index: {}]   ;;  %s725_s0 = inlined_call_operand.vmem [shape: f32[64,15], index: 0, kind: input, shape index: {}]   ;;  %s726_s3 = inlined_call_operand.vmem [shape: f32[128,16], index: 3, kind: input, shape index: {}]   ;;  %s727_s2 = inlined_call_operand.vmem [shape: f32[1,128], index: 2, kind: input, shape index: {}]   ;;  %s728_s4 = inlined_call_operand.vmem [shape: f32[1,16], index: 4, kind: input, shape index: {}]   ;;  %s729_s5 = inlined_call_operand.vmem [shape: f32[64,16], index: 5, kind: output, shape index: {}]  }
   0x1   :  { %v60_v0 = vld [vmem:[%s724_s1] sm:$0xff]  ;;  %v61_v1 = vld [vmem:[%s724_s1 + $0x8] sm:$0x7f]  ;;  %vm597_vm2 = vmpackc.low %vm94_vm0, %vm560_vm1 }
   0x2   :  { %v489_v3 = vpack.c.bf16 %v61_v1, %v60_v0  ;;  %v20_v4 = vld [vmem:[%s725_s0] sm:$0xff]  ;;  %v21_v5 = vld [vmem:[%s725_s0 + $0x8] sm:$0xff]  ;;  %v22_v6 = vld [vmem:[%s725_s0 + $0x10] sm:$0xff] }
   0x3   :  { %vm28_vm4 = vcmp.lt.f32.partialorder %v20_v4, 0.0  ;;  %v36_v7 = vceil.f32 %v20_v4  ;;  %v44_v8 = vfloor.f32 %v20_v4  ;;  %vm29_vm5 = vcmp.lt.f32.partialorder %v21_v5, 0.0  ;;  %v23_v9 = vld [vmem:[%s725_s0 + $0x18] sm:$0xff]  ;;  %v24_v10 = vld [vmem:[%s725_s0 + $0x20] sm:$0xff]  ;;  %v25_v17 = vld [vmem:[%s725_s0 + $0x28] sm:$0xff] }
   0x4   :  { %491 = vmatprep.subr.msk.bf16.mxu0 %vm597_vm2, %v489_v3  ;;  %v37_v11 = vceil.f32 %v21_v5  ;;  %v45_v12 = vfloor.f32 %v21_v5  ;;  %vm30_vm6 = vcmp.lt.f32.partialorder %v22_v6, 0.0  ;;  %v38_v13 = vceil.f32 %v22_v6  ;;  %v26_v21 = vld [vmem:[%s725_s0 + $0x30] sm:$0xff]  ;;  %v243_v22 = vld [vmem:[%s726_s3] sm:$0xff]  ;;  %v244_v25 = vld [vmem:[%s726_s3 + $0x8] sm:$0xff] }
   0x5   :  { %494 = vmatpush3.bf16.msk.msra.mxu0 %vm597_vm2, %v489_v3  ;;  %v52_v14 = vsel %vm28_vm4, %v36_v7, %v44_v8  ;;  %v46_v15 = vfloor.f32 %v22_v6  ;;  %v39_v16 = vceil.f32 %v23_v9  ;;  %vm31_vm7 = vcmp.lt.f32.partialorder %v23_v9, 0.0  ;;  %v245_v26 = vld [vmem:[%s726_s3 + $0x10] sm:$0xff]  ;;  %v246_v27 = vld [vmem:[%s726_s3 + $0x18] sm:$0xff]  ;;  %v247_v37 = vld [vmem:[%s726_s3 + $0x20] sm:$0xff] }
   0x6   :  { %433 = vmatprep.mubr.msk.f32.mxu0 %vm69_vm3, %v52_v14  ;;  %v53_v18 = vsel %vm29_vm5, %v37_v11, %v45_v12  ;;  %v47_v19 = vfloor.f32 %v23_v9  ;;  %v40_v20 = vceil.f32 %v24_v10  ;;  %vm32_vm8 = vcmp.lt.f32.partialorder %v24_v10, 0.0  ;;  %v27_v34 = vld [vmem:[%s725_s0 + $0x38] sm:$0xff]  ;;  %v248_v38 = vld [vmem:[%s726_s3 + $0x28] sm:$0xff]  ;;  %v249_v45 = vld [vmem:[%s726_s3 + $0x30] sm:$0xff] }
   0x7   :  { %v54_v23 = vsel %vm30_vm6, %v38_v13, %v46_v15  ;;  %v48_v24 = vfloor.f32 %v24_v10  ;;  %vm33_vm9 = vcmp.lt.f32.partialorder %v25_v17, 0.0  ;;  %v41_v29 = vceil.f32 %v25_v17  ;;  %v250_v46 = vld [vmem:[%s726_s3 + $0x38] sm:$0xff]  ;;  %v251_v48 = vld [vmem:[%s726_s3 + $0x40] sm:$0xff]  ;;  %v252_v49 = vld [vmem:[%s726_s3 + $0x48] sm:$0xff] }
   0x8   :  { %434 = vmatmul.mubr.msk.f32.vlgmr.msra.gmra.mrb[0].mxu0 %vm69_vm3, %v53_v18  ;;  %v55_v28 = vsel %vm31_vm7, %v39_v16, %v47_v19  ;;  %v49_v30 = vfloor.f32 %v25_v17  ;;  %v42_v31 = vceil.f32 %v26_v21  ;;  %v50_v33 = vfloor.f32 %v26_v21  ;;  %v253_v51 = vld [vmem:[%s726_s3 + $0x50] sm:$0xff]  ;;  %v254_v52 = vld [vmem:[%s726_s3 + $0x58] sm:$0xff]  ;;  %v255_v54 = vld [vmem:[%s726_s3 + $0x60] sm:$0xff] }
   0x9   :  { %436 = vmatprep.mubr.msk.f32.mxu0 %vm69_vm3, %v54_v23  ;;  %v56_v32 = vsel %vm32_vm8, %v40_v20, %v48_v24  ;;  %v495_v35 = vpack.c.bf16 %v244_v25, %v243_v22  ;;  %v499_v36 = vpack.c.bf16 %v246_v27, %v245_v26  ;;  %vm34_vm10 = vcmp.lt.f32.partialorder %v26_v21, 0.0  ;;  %v256_v55 = vld [vmem:[%s726_s3 + $0x68] sm:$0xff]  ;;  %v257_v57 = vld [vmem:[%s726_s3 + $0x70] sm:$0xff]  ;;  %v258_v58 = vld [vmem:[%s726_s3 + $0x78] sm:$0xff] }
   0xa   :  { %v57_v39 = vsel %vm33_vm9, %v41_v29, %v49_v30  ;;  %v43_v40 = vceil.f32 %v27_v34  ;;  %v51_v41 = vfloor.f32 %v27_v34  ;;  %v58_v42 = vsel %vm34_vm10, %v42_v31, %v50_v33  ;;  %v384_v60 = vld [vmem:[%s727_s2] ss:$0 sm:$0xff] }
   0xb   :  { %496 = vmatprep.subr.bf16.mxu0 %v495_v35  ;;  %vm35_vm11 = vcmp.lt.f32.partialorder %v27_v34, 0.0  ;;  %527 = vmatprep.subr.bf16.mxu1 %v495_v35  ;;  %v503_v43 = vpack.c.bf16 %v248_v38, %v247_v37  ;;  %v507_v47 = vpack.c.bf16 %v250_v46, %v249_v45  ;;  %v511_v50 = vpack.c.bf16 %v252_v49, %v251_v48 }
   0xc   :  { %437 = vmatmul.mubr.msk.f32.gmra.mrb[2].mxu0 %vm69_vm3, %v55_v28  ;;  %535 = vmatpush3.bf16.msra.mxu1 %v495_v35  ;;  %v59_v44 = vsel %vm35_vm11, %v43_v40, %v51_v41  ;;  %v515_v53 = vpack.c.bf16 %v254_v52, %v253_v51  ;;  %v519_v56 = vpack.c.bf16 %v256_v55, %v255_v54 }
   0xd   :  { %439 = vmatprep.mubr.msk.f32.mxu0 %vm69_vm3, %v56_v32  ;;  %498 = vmatpush3.bf16.msra.mxu0 %v495_v35  ;;  %v523_v59 = vpack.c.bf16 %v258_v58, %v257_v57 }
   0xe   :  { %500 = vmatprep.subr.bf16.mxu0 %v499_v36  ;;  %528 = vmatprep.subr.bf16.mxu1 %v499_v36 }
  0x10   :  { %440 = vmatmul.mubr.msk.f32.gmra.mrb[4].mxu0 %vm69_vm3, %v57_v39  ;;  %536 = vmatpush3.bf16.msra.mxu1 %v499_v36 }
  0x11   :  { %442 = vmatprep.mubr.msk.f32.mxu0 %vm69_vm3, %v58_v42  ;;  %502 = vmatpush3.bf16.msra.mxu0 %v499_v36 }
  0x12   :  { %504 = vmatprep.subr.bf16.mxu0 %v503_v43  ;;  %529 = vmatprep.subr.bf16.mxu1 %v503_v43 }
  0x14   :  { %443 = vmatmul.mubr.msk.f32.gmra.mrb[6].mxu0 %vm69_vm3, %v59_v44  ;;  %537 = vmatpush3.bf16.msra.mxu1 %v503_v43 }
  0x15   :  { %506 = vmatpush3.bf16.msra.mxu0 %v503_v43  ;;  %530 = vmatprep.subr.bf16.mxu1 %v507_v47 }
  0x16   :  { %508 = vmatprep.subr.bf16.mxu0 %v507_v47 }
  0x18   :  { %538 = vmatpush3.bf16.msra.mxu1 %v507_v47 }
  0x19   :  { %510 = vmatpush3.bf16.msra.mxu0 %v507_v47  ;;  %531 = vmatprep.subr.bf16.mxu1 %v511_v50 }
  0x1a   :  { %512 = vmatprep.subr.bf16.mxu0 %v511_v50 }
  0x1c   :  { %539 = vmatpush3.bf16.msra.mxu1 %v511_v50 }
  0x1d   :  { %514 = vmatpush3.bf16.msra.mxu0 %v511_v50  ;;  %532 = vmatprep.subr.bf16.mxu1 %v515_v53 }
  0x1e   :  { %516 = vmatprep.subr.bf16.mxu0 %v515_v53 }
  0x20   :  { %540 = vmatpush3.bf16.msra.mxu1 %v515_v53 }
  0x21   :  { %518 = vmatpush3.bf16.msra.mxu0 %v515_v53  ;;  %533 = vmatprep.subr.bf16.mxu1 %v519_v56  ;;  %v394_v53 = vld [vmem:[%s728_s4] ss:$0 sm:$0xff] }
  0x22   :  { %520 = vmatprep.subr.bf16.mxu0 %v519_v56 }
  0x24   :  { %541 = vmatpush3.bf16.msra.mxu1 %v519_v56 }
  0x25   :  { %522 = vmatpush3.bf16.msra.mxu0 %v519_v56  ;;  %534 = vmatprep.subr.bf16.mxu1 %v523_v59 }
  0x26   :  { %524 = vmatprep.subr.bf16.mxu0 %v523_v59 }
  0x28   :  { %542 = vmatpush3.bf16.msra.mxu1 %v523_v59 }
  0x29   :  { %526 = vmatpush3.bf16.msra.mxu0 %v523_v59 }
  0xdb   :  { %v435_v61 = vpop.f32.mrb[0].mxu0 }
  0xdc   :  { %v170_v62 = vadd.f32 %v435_v61, %v384_v60  ;;  %v164_v63 = vpop.f32.mrb[1].mxu0 }
  0xdd   :  { %v165_v0 = vadd.f32 %v384_v60, %v164_v63 }
  0xde   :  { %v212_v1 = vmul.f32 0.70710677, %v170_v62  ;;  %v204_v26 = vmul.f32 0.5, %v170_v62 }
  0xdf   :  { %v211_v2 = vmul.f32 0.70710677, %v165_v0  ;;  %v438_v3 = vpop.f32.mrb[2].mxu0  ;;  %v203_v24 = vmul.f32 0.5, %v165_v0 }
  0xe0   :  { %544 = verf.f32 %v212_v1  ;;  %v180_v4 = vadd.f32 %v438_v3, %v384_v60  ;;  %v174_v5 = vpop.f32.mrb[3].mxu0 }
  0xe1   :  { %546 = verf.f32 %v211_v2  ;;  %v175_v6 = vadd.f32 %v384_v60, %v174_v5 }
  0xe2   :  { %v214_v7 = vmul.f32 0.70710677, %v180_v4  ;;  %v206_v34 = vmul.f32 0.5, %v180_v4 }
  0xe3   :  { %v213_v8 = vmul.f32 0.70710677, %v175_v6  ;;  %v441_v9 = vpop.f32.mrb[4].mxu0  ;;  %v205_v32 = vmul.f32 0.5, %v175_v6 }
  0xe4   :  { %548 = verf.f32 %v214_v7  ;;  %v190_v10 = vadd.f32 %v441_v9, %v384_v60  ;;  %v184_v11 = vpop.f32.mrb[5].mxu0 }
  0xe5   :  { %550 = verf.f32 %v213_v8  ;;  %v185_v12 = vadd.f32 %v384_v60, %v184_v11 }
  0xe6   :  { %v216_v13 = vmul.f32 0.70710677, %v190_v10  ;;  %v208_v42 = vmul.f32 0.5, %v190_v10 }
  0xe7   :  { %v215_v14 = vmul.f32 0.70710677, %v185_v12  ;;  %v444_v15 = vpop.f32.mrb[6].mxu0  ;;  %v207_v40 = vmul.f32 0.5, %v185_v12 }
  0xe8   :  { %552 = verf.f32 %v216_v13  ;;  %v200_v16 = vadd.f32 %v444_v15, %v384_v60  ;;  %v194_v17 = vpop.f32.mrb[7].mxu0 }
  0xe9   :  { %554 = verf.f32 %v215_v14  ;;  %v195_v18 = vadd.f32 %v384_v60, %v194_v17 }
  0xea   :  { %v545_v19 = vpop.eup %544  ;;  %v218_v20 = vmul.f32 0.70710677, %v200_v16  ;;  %v210_v50 = vmul.f32 0.5, %v200_v16 }
  0xeb   :  { %v547_v21 = vpop.eup %546  ;;  %v228_v22 = vadd.f32 1.0, %v545_v19  ;;  %v217_v23 = vmul.f32 0.70710677, %v195_v18  ;;  %v209_v48 = vmul.f32 0.5, %v195_v18 }
  0xec   :  { %v227_v25 = vadd.f32 1.0, %v547_v21  ;;  %556 = verf.f32 %v218_v20 }
  0xed   :  { %558 = verf.f32 %v217_v23  ;;  %v236_v30 = vmul.f32 %v228_v22, %v204_v26 }
  0xee   :  { %v549_v27 = vpop.eup %548  ;;  %v235_v28 = vmul.f32 %v227_v25, %v203_v24 }
  0xef   :  { %v551_v29 = vpop.eup %550  ;;  %v230_v31 = vadd.f32 1.0, %v549_v27 }
  0xf0   :  { %477 = vmatprep.mubr.f32.mxu0 %v235_v28  ;;  %v229_v33 = vadd.f32 1.0, %v551_v29 }
  0xf1   :  { %478 = vmatmul.mubr.f32.vlgmr.msra.gmra.mrb[8].mxu0 %v236_v30  ;;  %v238_v39 = vmul.f32 %v230_v31, %v206_v34 }
  0xf2   :  { %v553_v35 = vpop.eup %552  ;;  %v237_v36 = vmul.f32 %v229_v33, %v205_v32 }
  0xf3   :  { %v555_v37 = vpop.eup %554  ;;  %v232_v38 = vadd.f32 1.0, %v553_v35 }
  0xf4   :  { %v231_v41 = vadd.f32 1.0, %v555_v37  ;;  %480 = vmatprep.mubr.f32.mxu1 %v237_v36 }
  0xf5   :  { %481 = vmatmul.mubr.f32.vlgmr.msra.gmra.mrb[0].mxu1 %v238_v39  ;;  %v240_v47 = vmul.f32 %v232_v38, %v208_v42 }
  0xf6   :  { %v557_v43 = vpop.eup %556  ;;  %v239_v44 = vmul.f32 %v231_v41, %v207_v40 }
  0xf7   :  { %v559_v45 = vpop.eup %558  ;;  %v234_v46 = vadd.f32 1.0, %v557_v43 }
  0xf8   :  { %v233_v49 = vadd.f32 1.0, %v559_v45  ;;  %483 = vmatprep.mubr.f32.mxu1 %v239_v44 }
  0xf9   :  { %484 = vmatmul.mubr.f32.gmra.mrb[2].mxu1 %v240_v47  ;;  %v242_v52 = vmul.f32 %v234_v46, %v210_v50 }
  0xfa   :  { %v241_v51 = vmul.f32 %v233_v49, %v209_v48 }
  0xfc   :  { %486 = vmatprep.mubr.f32.mxu1 %v241_v51 }
  0xfd   :  { %487 = vmatmul.mubr.f32.gmra.mrb[4].mxu1 %v242_v52 }
 0x1c4   :  { %v479_v54 = vpop.f32.mrb[8].mxu0 }
 0x1c5   :  { %v338_v55 = vadd.f32 %v479_v54, %v394_v53  ;;  %v332_v56 = vpop.f32.mrb[9].mxu0 }
 0x1c6   :  { %v333_v57 = vadd.f32 %v394_v53, %v332_v56 }
 0x1c7   :  { %373 = vst.msk [vmem:[%s729_s5 + $0x8] sm:$0xff] %vm371_vm12, %v338_v55 }
 0x1c8   :  { %372 = vst.msk [vmem:[%s729_s5] sm:$0xff] %vm371_vm12, %v333_v57  ;;  %v482_v58 = vpop.f32.mrb[0].mxu1 }
 0x1c9   :  { %v348_v59 = vadd.f32 %v482_v58, %v394_v53  ;;  %v342_v60 = vpop.f32.mrb[1].mxu1 }
 0x1ca   :  { %v343_v61 = vadd.f32 %v394_v53, %v342_v60 }
 0x1cb   :  { %375 = vst.msk [vmem:[%s729_s5 + $0x18] sm:$0xff] %vm371_vm12, %v348_v59 }
 0x1cc   :  { %374 = vst.msk [vmem:[%s729_s5 + $0x10] sm:$0xff] %vm371_vm12, %v343_v61  ;;  %v485_v62 = vpop.f32.mrb[2].mxu1 }
 0x1cd   :  { %v358_v63 = vadd.f32 %v485_v62, %v394_v53  ;;  %v352_v0 = vpop.f32.mrb[3].mxu1 }
 0x1ce   :  { %v353_v1 = vadd.f32 %v394_v53, %v352_v0 }
 0x1cf   :  { %377 = vst.msk [vmem:[%s729_s5 + $0x28] sm:$0xff] %vm371_vm12, %v358_v63 }
 0x1d0   :  { %376 = vst.msk [vmem:[%s729_s5 + $0x20] sm:$0xff] %vm371_vm12, %v353_v1  ;;  %v488_v2 = vpop.f32.mrb[4].mxu1 }
 0x1d1   :  { %v368_v3 = vadd.f32 %v488_v2, %v394_v53  ;;  %v362_v4 = vpop.f32.mrb[5].mxu1 }
 0x1d2   :  { %v363_v5 = vadd.f32 %v394_v53, %v362_v4 }
 0x1d3   :  { %379 = vst.msk [vmem:[%s729_s5 + $0x38] sm:$0xff] %vm371_vm12, %v368_v3 }
 0x1d4   :  { %378 = vst.msk [vmem:[%s729_s5 + $0x30] sm:$0xff] %vm371_vm12, %v363_v5 }

</bundles_post_ra>
